<compile_context>
chip_gen: v5e
topology: v5e:2x2
jax: 0.10.0
libtpu: 0.0.40
codegen_flags: <defaults>
</compile_context>

<pallas_src>
import functools

import jax
import jax.numpy as jnp
from jax.experimental import pallas as pl
from jax.experimental.pallas import tpu as pltpu

LANE = 128  # lane width (last dim); all padded dims are multiples of this.


# ------------------------------- small helpers ------------------------------ #

def _round_up(x, m):
    return ((x + m - 1) // m) * m


def _pad_to(x, shape):
    return jnp.pad(x, [(0, s - d) for d, s in zip(x.shape, shape)])


def _pick_tile(total, candidates):
    for c in candidates:
        if total % c == 0:
            return c
    return LANE


def _vmem_limit_bytes():
    # ~96 MiB on v5e/v6e (128 MiB physical VMEM), ~48 MiB on v7x (64 MiB per TC).
    try:
        cap = int(pltpu.get_tpu_info().vmem_capacity_bytes)
    except Exception:
        cap = 128 * 1024 * 1024
    return min(100 * 1024 * 1024, (cap * 3) // 4)


def _buffered_spec(block_shape, index_map, buffers=2):
    """BlockSpec with explicit multi-buffering for the HBM-bound A stream.

    Falls back to the default (double-buffered) BlockSpec if this jax build
    does not expose `pipeline_mode=` / `pl.Buffered`.
    """
    try:
        return pl.BlockSpec(block_shape, index_map,
                            pipeline_mode=pl.Buffered(buffers))
    except (TypeError, AttributeError):
        return pl.BlockSpec(block_shape, index_map)


# ------------------------------ per-layer kernel ----------------------------- #

def rgcn_layer_kernel(h_ref, a_ref, w_ref, b_ref, o_ref, acc_ref,
                      *, num_rels, f_in_p, tm, tk, apply_relu):
    """One RelGraphConv layer, row tile m x contraction tile k.

    Refs:
      h_ref  : [Np, f_in_p]              bf16, resident (constant index_map)
      a_ref  : [num_rels, tm, tk]        bf16 A tile (the only pipelined stream)
      w_ref  : [(num_rels+1)*f_in_p, f_out_p] bf16 stacked [W_self; W_0; W_1]
      b_ref  : [1, f_out_p]              f32 bias
      o_ref  : [tm, f_out_p]             bf16 (hidden layers) / f32 (last layer)
      acc_ref: [tm, num_rels*f_in_p]     f32 scratch, persists across the k axis
    """
    m = pl.program_id(0)
    k = pl.program_id(1)

    @pl.when(k == 0)
    def _init():
        acc_ref[...] = jnp.zeros_like(acc_ref)

    # Accumulate AH_r over the contraction (column) tiles of A.
    k0 = pl.multiple_of(k * tk, tk)
    h_k = h_ref[pl.ds(k0, tk), :]                       # bf16 [tk, f_in_p]
    for r in range(num_rels):
        acc_ref[:, r * f_in_p:(r + 1) * f_in_p] += jnp.dot(
            a_ref[r], h_k, preferred_element_type=jnp.float32)

    @pl.when(k == pl.num_programs(1) - 1)
    def _finalize():
        m0 = pl.multiple_of(m * tm, tm)
        # Self-loop rows. TODO(synk): real DGL MFG blocks have dst ⊂ src; the
        # self-loop should then read the dst slice of h (dense stand-in: src==dst).
        h_m = h_ref[pl.ds(m0, tm), :]                   # bf16 [tm, f_in_p]
        # Single wide-K MXU matmul: [h | AH_0 | AH_1] @ [W_self; W_0; W_1].
        x = jnp.concatenate([h_m, acc_ref[...].astype(jnp.bfloat16)], axis=-1)
        out = jnp.dot(x, w_ref[...], preferred_element_type=jnp.float32)
        out = out + b_ref[...]                          # f32 bias on the VPU
        if apply_relu:
            out = jnp.maximum(out, 0.0)                 # relu; last layer: none
        o_ref[...] = out.astype(o_ref.dtype)            # lane-dense (128-wide) store


def _rgcn_layer_call(h_p, adj_p, w_stack_p, bias_p, *, tm, tk, apply_relu,
                     out_dtype, vmem_limit):
    num_rels, np_, _ = adj_p.shape
    f_in_p = h_p.shape[1]
    f_out_p = w_stack_p.shape[1]
    grid = (np_ // tm, np_ // tk)

    kernel = functools.partial(
        rgcn_layer_kernel, num_rels=num_rels, f_in_p=f_in_p,
        tm=tm, tk=tk, apply_relu=apply_relu)

    return pl.pallas_call(
        kernel,
        grid=grid,
        in_specs=[
            # H resident across the whole grid (fetched once, no re-DMA per tile).
            pl.BlockSpec((np_, f_in_p), lambda m, k: (0, 0)),
            # A row/K tiles: the only HBM-bound, multi-buffered stream.
            _buffered_spec((num_rels, tm, tk), lambda m, k: (0, m, k), buffers=2),
            # Stacked weights + bias: resident.
            pl.BlockSpec((w_stack_p.shape[0], f_out_p), lambda m, k: (0, 0)),
            pl.BlockSpec((1, f_out_p), lambda m, k: (0, 0)),
        ],
        out_specs=pl.BlockSpec((tm, f_out_p), lambda m, k: (m, 0)),
        out_shape=jax.ShapeDtypeStruct((np_, f_out_p), out_dtype),
        scratch_shapes=[pltpu.VMEM((tm, num_rels * f_in_p), jnp.float32)],
        compiler_params=pltpu.CompilerParams(
            # Row axis parallel (v7x megacore), contraction axis arbitrary.
            dimension_semantics=("parallel", "arbitrary"),
            vmem_limit_bytes=vmem_limit),
    )(h_p, adj_p, w_stack_p, bias_p)


# ------------------------------ host-side prep ------------------------------- #

def _prep_layer(block_adj, p, np_, f_in_p, f_out_p):
    """Cast to bf16 BEFORE padding (no padded f32 copies of A on the host)."""
    num_rels = p["w_rel"].shape[0]
    # TODO(synk): for very large graphs, quantize A to int8 (v5e/v6e) / fp8 (v7x)
    # with a per-row scale to halve the dominant HBM stream.
    adj = _pad_to(block_adj.astype(jnp.bfloat16), (num_rels, np_, np_))
    w_self = _pad_to(p["w_self"].astype(jnp.bfloat16), (f_in_p, f_out_p))
    w_rel = _pad_to(p["w_rel"].astype(jnp.bfloat16), (num_rels, f_in_p, f_out_p))
    # Stack along the contraction dim so the kernel issues one K=(R+1)*f_in matmul.
    w_stack = jnp.concatenate(
        [w_self, w_rel.reshape(num_rels * f_in_p, f_out_p)], axis=0)
    bias = _pad_to(p["bias"].astype(jnp.float32), (1, f_out_p))
    return adj, w_stack, bias


def rgcn_forward(params, blocks, features, out_dim):
    """RGCN forward. Padded node rows (>= n) accumulate relu(bias) through the
    hidden layers; this is harmless because padded A columns are zero (real rows
    never read them) and the padded output is sliced back to [N, out_dim]."""
    num_layers = len(params)
    n, in_dim = features.shape
    np_ = _round_up(n, LANE)

    f_dims = [in_dim] + [p["w_self"].shape[1] for p in params]
    f_pads = [_round_up(d, LANE) for d in f_dims]

    # Tile sizes: TM bounded for v7x's smaller VMEM; TK keeps >=512-wide DMAs
    # on the A stream when N allows it.
    tm = _pick_tile(np_, (256, 128))
    tk = _pick_tile(np_, (2048, 1024, 512, 256, 128))
    vmem_limit = _vmem_limit_bytes()

    # TODO(synk): when true f_out << f_in, a contract-features-first association
    # (A @ (H W_r)) with an HW prepass would cut A-matmul FLOPs; the fused
    # wide-K form is used here since it composes with row-parallel sharding.
    h = _pad_to(features.astype(jnp.bfloat16), (np_, f_pads[0]))
    for l in range(num_layers):
        adj, w_stack, bias = _prep_layer(blocks[l], params[l], np_,
                                         f_pads[l], f_pads[l + 1])
        last = (l == num_layers - 1)
        # TODO(synk): training-mode dropout before layers 1..L-1 omitted (eval: identity).
        h = _rgcn_layer_call(
            h, adj, w_stack, bias, tm=tm, tk=tk, apply_relu=not last,
            out_dtype=jnp.float32 if last else jnp.bfloat16,
            vmem_limit=vmem_limit)

    return h[:n, :out_dim]


# ------------------------------ parameter init ------------------------------- #

def init_params(key, in_dim, hidden_dim, out_dim, n_layers, num_rels=2):
    # RGCN builds n_layers + 1 RelGraphConv layers:
    #   (in -> hidden), (hidden -> hidden) * (n_layers - 1), (hidden -> out)
    dims = ([(in_dim, hidden_dim)]
            + [(hidden_dim, hidden_dim)] * (n_layers - 1)
            + [(hidden_dim, out_dim)])
    params = []
    keys = jax.random.split(key, len(dims))
    for k, (fi, fo) in zip(keys, dims):
        k1, k2, k3 = jax.random.split(k, 3)
        bound = 1.0 / jnp.sqrt(jnp.float32(fi))
        params.append({
            "w_rel": jax.random.uniform(k1, (num_rels, fi, fo), jnp.float32, -bound, bound),
            "w_self": jax.random.uniform(k2, (fi, fo), jnp.float32, -bound, bound),
            "bias": jax.random.uniform(k3, (1, fo), jnp.float32, -bound, bound),
        })
    return params


# ----------------------------- pure-JAX reference ---------------------------- #

def rgcn_reference(params, blocks, features):
    h = features
    num_layers = len(params)
    for l, (p, adj) in enumerate(zip(params, blocks)):
        msg = sum(adj[r] @ h @ p["w_rel"][r] for r in range(adj.shape[0]))
        h_new = msg + h @ p["w_self"] + p["bias"]
        h = jnp.maximum(h_new, 0.0) if l != num_layers - 1 else h_new
    return h


# ----------------------------------- main ------------------------------------ #

if __name__ == "__main__":
    key = jax.random.PRNGKey(0)
    k_graph, k_feat, k_param = jax.random.split(key, 3)

    N = 20            # nodes
    IN_DIM = 16
    HIDDEN_DIM = 32
    OUT_DIM = 8
    N_LAYERS = 2      # -> 3 RelGraphConv layers total
    NUM_RELS = 2
    num_conv_layers = N_LAYERS + 1

    def make_rel_adj(k, n, num_rels):
        # Dense stand-in for a DGL block: per-relation right-normalized adjacency.
        ks = jax.random.split(k, num_rels)
        adjs = []
        for kr in ks:
            a = (jax.random.uniform(kr, (n, n), jnp.float32) < 0.3).astype(jnp.float32)
            deg = jnp.sum(a, axis=1, keepdims=True)
            adjs.append(a / jnp.maximum(deg, 1.0))
        return jnp.stack(adjs)

    graph_keys = jax.random.split(k_graph, num_conv_layers)
    blocks = [make_rel_adj(gk, N, NUM_RELS) for gk in graph_keys]
    features = jax.random.normal(k_feat, (N, IN_DIM), jnp.float32)

    params = init_params(k_param, IN_DIM, HIDDEN_DIM, OUT_DIM, N_LAYERS, NUM_RELS)

    out = rgcn_forward(params, blocks, features, OUT_DIM)
    out = jax.block_until_ready(out)

    assert out.shape == (N, OUT_DIM), out.shape
    assert bool(jnp.all(jnp.isfinite(out)))

    # bf16 operands (double rounding through 3 layers) vs f32 reference: expect
    # ~1e-2 absolute drift; validate with an explicit tolerance.
    ref = rgcn_reference(params, blocks, features)
    max_err = float(jnp.max(jnp.abs(out - ref)))
    assert max_err < 1e-1, f"max abs error vs f32 reference: {max_err}"

    print("KERNEL_OK")
</pallas_src>

<mosaic_0001>
module attributes {stable_mosaic.version = 11 : i64} {
  func.func @rgcn_layer_kernel(%arg0: i32, %arg1: i32, %arg2: memref<128x128xbf16, #tpu.memory_space<vmem>>, %arg3: memref<2x128x128xbf16, #tpu.memory_space<vmem>>, %arg4: memref<384x128xbf16, #tpu.memory_space<vmem>>, %arg5: memref<1x128xf32, #tpu.memory_space<vmem>>, %arg6: memref<128x128xbf16, #tpu.memory_space<vmem>>, %arg7: memref<128x256xf32, #tpu.memory_space<vmem>>) attributes {dimension_semantics = [#tpu.dimension_semantics<parallel>, #tpu.dimension_semantics<arbitrary>], iteration_bounds = array<i64: 1, 1>, scalar_prefetch = 0 : i64, scratch_operands = 1 : i64, tpu.core_type = #tpu.core_type<tc>, window_params = [{pipeline_mode = #tpu.pipeline_mode<synchronous>, transform_indices = @transform_0, window_bounds = array<i64: 128, 128>}, {pipeline_mode = #tpu.pipeline_mode<double_buffered>, transform_indices = @transform_1, window_bounds = array<i64: 2, 128, 128>}, {pipeline_mode = #tpu.pipeline_mode<synchronous>, transform_indices = @transform_2, window_bounds = array<i64: 384, 128>}, {pipeline_mode = #tpu.pipeline_mode<synchronous>, transform_indices = @transform_3, window_bounds = array<i64: 1, 128>}, {transform_indices = @transform_4, window_bounds = array<i64: 128, 128>}]} {
    %c0_i32 = arith.constant 0 : i32
    %0 = arith.cmpi eq, %arg1, %c0_i32 : i32
    %1 = arith.extui %0 : i1 to i32
    %c0_i32_0 = arith.constant 0 : i32
    %2 = arith.cmpi ne, %1, %c0_i32_0 : i32
    scf.if %2 {
      %cst_16 = arith.constant 0.000000e+00 : f32
      %22 = vector.broadcast %cst_16 : f32 to vector<128x256xf32>
      %c0_17 = arith.constant 0 : index
      %c0_18 = arith.constant 0 : index
      %23 = vector.load %arg7[%c0_17, %c0_18] : memref<128x256xf32, #tpu.memory_space<vmem>>, vector<128x256xf32>
      tpu.vector_store %arg7[%c0_17, %c0_18], %22 {strides = array<i32>} : memref<128x256xf32, #tpu.memory_space<vmem>>, vector<128x256xf32>,
    } else {
    }
    %c128_i32 = arith.constant 128 : i32
    %3 = arith.muli %arg1, %c128_i32 : i32
    %4 = tpu.assume_multiple %3, 128 : i32
    %5 = arith.index_cast %4 : i32 to index
    %c0 = arith.constant 0 : index
    %6 = vector.load %arg2[%5, %c0] : memref<128x128xbf16, #tpu.memory_space<vmem>>, vector<128x128xbf16>
    %c0_1 = arith.constant 0 : index
    %c0_2 = arith.constant 0 : index
    %7 = vector.load %arg7[%c0_1, %c0_2] : memref<128x256xf32, #tpu.memory_space<vmem>>, vector<128x128xf32>
    %c0_3 = arith.constant 0 : index
    %c0_4 = arith.constant 0 : index
    %c0_5 = arith.constant 0 : index
    %8 = vector.load %arg3[%c0_3, %c0_4, %c0_5] : memref<2x128x128xbf16, #tpu.memory_space<vmem>>, vector<1x128x128xbf16>
    %9 = vector.shape_cast %8 : vector<1x128x128xbf16> to vector<128x128xbf16>
    %cst = arith.constant dense<0.000000e+00> : vector<128x128xf32>
    %10 = tpu.matmul %9, %6, %cst {dimension_numbers = #tpu.dot_dimension_numbers<[1], [0], [0], [1], [0, 0, 1, 1], [], []>} : vector<128x128xbf16>, vector<128x128xbf16>, vector<128x128xf32> -> vector<128x128xf32>
    %11 = arith.addf %7, %10 : vector<128x128xf32>
    %c0_6 = arith.constant 0 : index
    %c0_7 = arith.constant 0 : index
    %12 = vector.load %arg7[%c0_6, %c0_7] : memref<128x256xf32, #tpu.memory_space<vmem>>, vector<128x128xf32>
    tpu.vector_store %arg7[%c0_6, %c0_7], %11 {strides = array<i32>} : memref<128x256xf32, #tpu.memory_space<vmem>>, vector<128x128xf32>,
    %c0_8 = arith.constant 0 : index
    %c128 = arith.constant 128 : index
    %13 = vector.load %arg7[%c0_8, %c128] : memref<128x256xf32, #tpu.memory_space<vmem>>, vector<128x128xf32>
    %c1 = arith.constant 1 : index
    %c0_9 = arith.constant 0 : index
    %c0_10 = arith.constant 0 : index
    %14 = vector.load %arg3[%c1, %c0_9, %c0_10] : memref<2x128x128xbf16, #tpu.memory_space<vmem>>, vector<1x128x128xbf16>
    %15 = vector.shape_cast %14 : vector<1x128x128xbf16> to vector<128x128xbf16>
    %cst_11 = arith.constant dense<0.000000e+00> : vector<128x128xf32>
    %16 = tpu.matmul %15, %6, %cst_11 {dimension_numbers = #tpu.dot_dimension_numbers<[1], [0], [0], [1], [0, 0, 1, 1], [], []>} : vector<128x128xbf16>, vector<128x128xbf16>, vector<128x128xf32> -> vector<128x128xf32>
    %17 = arith.addf %13, %16 : vector<128x128xf32>
    %c0_12 = arith.constant 0 : index
    %c128_13 = arith.constant 128 : index
    %18 = vector.load %arg7[%c0_12, %c128_13] : memref<128x256xf32, #tpu.memory_space<vmem>>, vector<128x128xf32>
    tpu.vector_store %arg7[%c0_12, %c128_13], %17 {strides = array<i32>} : memref<128x256xf32, #tpu.memory_space<vmem>>, vector<128x128xf32>,
    %c0_i32_14 = arith.constant 0 : i32
    %19 = arith.cmpi eq, %arg1, %c0_i32_14 : i32
    %20 = arith.extui %19 : i1 to i32
    %c0_i32_15 = arith.constant 0 : i32
    %21 = arith.cmpi ne, %20, %c0_i32_15 : i32
    scf.if %21 {
      %c128_i32_16 = arith.constant 128 : i32
      %22 = arith.muli %arg0, %c128_i32_16 : i32
      %23 = tpu.assume_multiple %22, 128 : i32
      %24 = arith.index_cast %23 : i32 to index
      %c0_17 = arith.constant 0 : index
      %25 = vector.load %arg2[%24, %c0_17] : memref<128x128xbf16, #tpu.memory_space<vmem>>, vector<128x128xbf16>
      %c0_18 = arith.constant 0 : index
      %c0_19 = arith.constant 0 : index
      %26 = vector.load %arg7[%c0_18, %c0_19] : memref<128x256xf32, #tpu.memory_space<vmem>>, vector<128x256xf32>
      %27 = arith.truncf %26 : vector<128x256xf32> to vector<128x256xbf16>
      %28 = tpu.concatenate %25, %27 in 1 : vector<128x128xbf16>, vector<128x256xbf16> -> vector<128x384xbf16>
      %c0_20 = arith.constant 0 : index
      %c0_21 = arith.constant 0 : index
      %29 = vector.load %arg4[%c0_20, %c0_21] : memref<384x128xbf16, #tpu.memory_space<vmem>>, vector<384x128xbf16>
      %cst_22 = arith.constant dense<0.000000e+00> : vector<128x128xf32>
      %30 = tpu.matmul %28, %29, %cst_22 {dimension_numbers = #tpu.dot_dimension_numbers<[1], [0], [0], [1], [0, 0, 1, 1], [], []>} : vector<128x384xbf16>, vector<384x128xbf16>, vector<128x128xf32> -> vector<128x128xf32>
      %c0_23 = arith.constant 0 : index
      %c0_24 = arith.constant 0 : index
      %31 = vector.load %arg5[%c0_23, %c0_24] : memref<1x128xf32, #tpu.memory_space<vmem>>, vector<1x128xf32>
      %32 = vector.broadcast %31 : vector<1x128xf32> to vector<128x128xf32>
      %33 = arith.addf %30, %32 : vector<128x128xf32>
      %cst_25 = arith.constant 0.000000e+00 : f32
      %34 = vector.broadcast %cst_25 : f32 to vector<128x128xf32>
      %35 = arith.maximumf %33, %34 : vector<128x128xf32>
      %36 = arith.truncf %35 : vector<128x128xf32> to vector<128x128xbf16>
      %c0_26 = arith.constant 0 : index
      %c0_27 = arith.constant 0 : index
      %37 = vector.load %arg6[%c0_26, %c0_27] : memref<128x128xbf16, #tpu.memory_space<vmem>>, vector<128x128xbf16>
      tpu.vector_store %arg6[%c0_26, %c0_27], %36 {strides = array<i32>} : memref<128x128xbf16, #tpu.memory_space<vmem>>, vector<128x128xbf16>,
    } else {
    }
    return
  }
  func.func @transform_0(%arg0: i32, %arg1: i32) -> (i32, i32) {
    %c0_i32 = arith.constant 0 : i32
    %c0_i32_0 = arith.constant 0 : i32
    %c0_i32_1 = arith.constant 0 : i32
    return %c0_i32, %c0_i32_0 : i32, i32
  }
  func.func @transform_1(%arg0: i32, %arg1: i32) -> (i32, i32, i32) {
    %c0_i32 = arith.constant 0 : i32
    %c0_i32_0 = arith.constant 0 : i32
    return %c0_i32, %arg0, %arg1 : i32, i32, i32
  }
  func.func @transform_2(%arg0: i32, %arg1: i32) -> (i32, i32) {
    %c0_i32 = arith.constant 0 : i32
    %c0_i32_0 = arith.constant 0 : i32
    %c0_i32_1 = arith.constant 0 : i32
    return %c0_i32, %c0_i32_0 : i32, i32
  }
  func.func @transform_3(%arg0: i32, %arg1: i32) -> (i32, i32) {
    %c0_i32 = arith.constant 0 : i32
    %c0_i32_0 = arith.constant 0 : i32
    %c0_i32_1 = arith.constant 0 : i32
    return %c0_i32, %c0_i32_0 : i32, i32
  }
  func.func @transform_4(%arg0: i32, %arg1: i32) -> (i32, i32) {
    %c0_i32 = arith.constant 0 : i32
    %c0_i32_0 = arith.constant 0 : i32
    return %arg0, %c0_i32 : i32, i32
  }
}

</mosaic_0001>

<bundles_post_ra>
// kernel: tpu_custom_call.1
= control target key start
LH: loop header
LB: loop body
LE: loop exit
PB: predicated region body
PF: predicated region fallthrough
CT: control target
= control target key end

     0   :  { %9 = vsyncpa [#allocation4], 0  ;;  %s1644_s0 = inlined_call_operand.hbm [shape: bf16[128,128], index: 0, kind: input, shape index: {}]   ;;  %s1645_s1 = inlined_call_operand.hbm [shape: bf16[2,128,128], index: 1, kind: input, shape index: {}]   ;;  %s1646_s2 = inlined_call_operand.hbm [shape: bf16[384,128], index: 2, kind: input, shape index: {}]   ;;  %s1647_s3 = inlined_call_operand.vmem [shape: f32[1,128], index: 3, kind: input, shape index: {}]   ;;  %s1648_s4 = inlined_call_operand.hbm [shape: bf16[128,128], index: 4, kind: output, shape index: {}]  }
   0x1   :  { %10 = vsyncpa [#allocation7], 0 }
   0x2   :  { %11 = vsyncpa [#allocation5], 0  ;;  %s29_s17 = sshll.u32 %s1645_s1, 4  ;;  %s1568_s18 = smov [#allocation6]   ;;  %s30_s17 = int_to_ptr.hbm [resolvable:$true] %s29_s17 }
   0x3   :  { %s31_s19 = sshll.u32 %s1568_s18, 4  ;;  %s16_s22 = sshll.u32 %s1644_s0, 4  ;;  %s32_s19 = int_to_ptr.vmem [resolvable:$true] %s31_s19  ;;  %s17_s22 = int_to_ptr.hbm [resolvable:$true] %s16_s22 }
   0x4   :  { %s1569_s23 = smov 64   ;;  %s1570_s24 = smov 4  }
   0x5   :  { %37 = dma.hbm_to_vmem [thread:$0]  %s30_s17, 2048, %s32_s19, [#allocation7], %s1569_s23, %s1569_s23, %s1570_s24  }
   0x6   :  { %s1571_s25 = smov [#allocation3]   ;;  %s42_s1 = sshll.u32 %s1646_s2, 4  ;;  %s43_s1 = int_to_ptr.hbm [resolvable:$true] %s42_s1 }
   0x7   :  { %s18_s26 = sshll.u32 %s1571_s25, 4  ;;  %s1572_s0 = smov [#allocation8]   ;;  %s19_s26 = int_to_ptr.vmem [resolvable:$true] %s18_s26 }
   0x8   :  { %24 = dma.hbm_to_vmem [thread:$0]  %s17_s22, 1024, %s19_s26, [#allocation4], %s1569_s23, %s1569_s23, %s1570_s24  }
   0x9   :  { %s44_s29 = sshll.u32 %s1572_s0, 4  ;;  %s45_s29 = int_to_ptr.vmem [resolvable:$true] %s44_s29 }
   0xa   :  { %50 = dma.hbm_to_vmem [thread:$0]  %s43_s1, 3072, %s45_s29, [#allocation7], %s1569_s23, %s1569_s23, %s1570_s24  }
   0xb   :  { %1562 = dma.done.wait [#allocation4], 1024  }
   0xc   :  { %1563 = vsyncadd [#allocation4], 4294966272 }
   0xd   :  { %1564 = dma.done.wait [#allocation7], 5120  }
   0xe   :  { %1565 = vsyncadd [#allocation7], 4294962176  ;;  %v1339_v0 = vld [vmem:[#allocation3 + $0x38] sm:$0xff]  ;;  %v1338_v1 = vld [vmem:[#allocation3 + $0x30] sm:$0xff]  ;;  %s1090_s8 = sshll.u32 %s1648_s4, 4  ;;  %s1091_s8 = int_to_ptr.hbm [resolvable:$true] %s1090_s8 }
   0xf   :  { %1435 = vmatpush.bf16.msra.mxu1 %v1339_v0  ;;  %250 = vmatpush.bf16.msra.mxu0 %v1339_v0  ;;  %v1337_v2 = vld [vmem:[#allocation3 + $0x28] sm:$0xff]  ;;  %v1336_v3 = vld [vmem:[#allocation3 + $0x20] sm:$0xff]  ;;  %v1335_v4 = vld [vmem:[#allocation3 + $0x18] sm:$0xff] }
  0x10   :  { %1436 = vmatpush.bf16.msra.mxu2 %v1339_v0  ;;  %1437 = vmatpush.bf16.msra.mxu3 %v1339_v0  ;;  %v1334_v5 = vld [vmem:[#allocation3 + $0x10] sm:$0xff]  ;;  %v1333_v6 = vld [vmem:[#allocation3 + $0x8] sm:$0xff]  ;;  %v1332_v7 = vld [vmem:[#allocation3] sm:$0xff] }
  0x11   :  { %v1342_v8 = vld [vmem:[#allocation6 + $0x10] sm:$0xff]  ;;  %v1340_v9 = vld [vmem:[#allocation6] sm:$0xff]  ;;  %v1343_v10 = vld [vmem:[#allocation6 + $0x18] sm:$0xff] }
  0x12   :  { %v1341_v11 = vld [vmem:[#allocation6 + $0x8] sm:$0xff]  ;;  %v1348_v12 = vld [vmem:[#allocation6 + $0x40] sm:$0xff]  ;;  %v1350_v15 = vld [vmem:[#allocation6 + $0x50] sm:$0xff] }
  0x13   :  { %1438 = vmatpush.bf16.msra.mxu1 %v1338_v1  ;;  %251 = vmatpush.bf16.msra.mxu0 %v1338_v1  ;;  %v1349_v13 = vld [vmem:[#allocation6 + $0x48] sm:$0xff]  ;;  %v1344_v14 = vld [vmem:[#allocation6 + $0x20] sm:$0xff]  ;;  %v1351_v17 = vld [vmem:[#allocation6 + $0x58] sm:$0xff] }
  0x14   :  { %1439 = vmatpush.bf16.msra.mxu2 %v1338_v1  ;;  %1440 = vmatpush.bf16.msra.mxu3 %v1338_v1  ;;  %v1345_v16 = vld [vmem:[#allocation6 + $0x28] sm:$0xff]  ;;  %v1346_v18 = vld [vmem:[#allocation6 + $0x30] sm:$0xff]  ;;  %v1352_v19 = vld [vmem:[#allocation6 + $0x60] sm:$0xff] }
  0x15   :  { %v1347_v20 = vld [vmem:[#allocation6 + $0x38] sm:$0xff]  ;;  %v1370_v22 = vld [vmem:[#allocation8 + $0x30] sm:$0xff]  ;;  %v1369_v24 = vld [vmem:[#allocation8 + $0x28] sm:$0xff] }
  0x16   :  { %v1371_v21 = vld [vmem:[#allocation8 + $0x38] sm:$0xff]  ;;  %v1353_v26 = vld [vmem:[#allocation6 + $0x68] sm:$0xff]  ;;  %v1368_v27 = vld [vmem:[#allocation8 + $0x20] sm:$0xff] }
  0x17   :  { %1441 = vmatpush.bf16.msra.mxu1 %v1337_v2  ;;  %252 = vmatpush.bf16.msra.mxu0 %v1337_v2  ;;  %v1379_v23 = vld [vmem:[#allocation8 + $0x78] sm:$0xff]  ;;  %v1378_v28 = vld [vmem:[#allocation8 + $0x70] sm:$0xff]  ;;  %v1377_v31 = vld [vmem:[#allocation8 + $0x68] sm:$0xff] }
  0x18   :  { %1442 = vmatpush.bf16.msra.mxu2 %v1337_v2  ;;  %1443 = vmatpush.bf16.msra.mxu3 %v1337_v2  ;;  %v1387_v25 = vld [vmem:[#allocation8 + $0xb8] sm:$0xff]  ;;  %v1386_v29 = vld [vmem:[#allocation8 + $0xb0] sm:$0xff]  ;;  %v1385_v32 = vld [vmem:[#allocation8 + $0xa8] sm:$0xff] }
  0x19   :  { %v1367_v30 = vld [vmem:[#allocation8 + $0x18] sm:$0xff]  ;;  %v1366_v33 = vld [vmem:[#allocation8 + $0x10] sm:$0xff]  ;;  %v1376_v34 = vld [vmem:[#allocation8 + $0x60] sm:$0xff] }
  0x1a   :  { %v1384_v35 = vld [vmem:[#allocation8 + $0xa0] sm:$0xff]  ;;  %v1365_v36 = vld [vmem:[#allocation8 + $0x8] sm:$0xff]  ;;  %v1375_v37 = vld [vmem:[#allocation8 + $0x58] sm:$0xff] }
  0x1b   :  { %1444 = vmatpush.bf16.msra.mxu1 %v1336_v3  ;;  %253 = vmatpush.bf16.msra.mxu0 %v1336_v3  ;;  %v1383_v38 = vld [vmem:[#allocation8 + $0x98] sm:$0xff]  ;;  %v1354_v39 = vld [vmem:[#allocation6 + $0x70] sm:$0xff]  ;;  %v1364_v41 = vld [vmem:[#allocation8] sm:$0xff] }
  0x1c   :  { %1445 = vmatpush.bf16.msra.mxu2 %v1336_v3  ;;  %1446 = vmatpush.bf16.msra.mxu3 %v1336_v3  ;;  %v1374_v42 = vld [vmem:[#allocation8 + $0x50] sm:$0xff]  ;;  %v1356_v44 = vld [vmem:[#allocation3] sm:$0xff]  ;;  %v1373_v45 = vld [vmem:[#allocation8 + $0x48] sm:$0xff] }
  0x1d   :  { %v1382_v43 = vld [vmem:[#allocation8 + $0x90] sm:$0xff]  ;;  %v1381_v46 = vld [vmem:[#allocation8 + $0x88] sm:$0xff]  ;;  %v1372_v48 = vld [vmem:[#allocation8 + $0x40] sm:$0xff] }
  0x1e   :  { %v1380_v49 = vld [vmem:[#allocation8 + $0x80] sm:$0xff]  ;;  %v1355_v50 = vld [vmem:[#allocation6 + $0x78] sm:$0xff]  ;;  %v1357_v52 = vld [vmem:[#allocation3 + $0x8] sm:$0xff] }
  0x1f   :  { %1447 = vmatpush.bf16.msra.mxu1 %v1335_v4  ;;  %254 = vmatpush.bf16.msra.mxu0 %v1335_v4  ;;  %v1358_v56 = vld [vmem:[#allocation3 + $0x10] sm:$0xff] }
  0x20   :  { %1448 = vmatpush.bf16.msra.mxu2 %v1335_v4  ;;  %1449 = vmatpush.bf16.msra.mxu3 %v1335_v4 }
  0x23   :  { %1450 = vmatpush.bf16.msra.mxu1 %v1334_v5  ;;  %255 = vmatpush.bf16.msra.mxu0 %v1334_v5 }
  0x24   :  { %1451 = vmatpush.bf16.msra.mxu2 %v1334_v5  ;;  %1452 = vmatpush.bf16.msra.mxu3 %v1334_v5 }
  0x27   :  { %1453 = vmatpush.bf16.msra.mxu1 %v1333_v6  ;;  %256 = vmatpush.bf16.msra.mxu0 %v1333_v6 }
  0x28   :  { %1454 = vmatpush.bf16.msra.mxu2 %v1333_v6  ;;  %1455 = vmatpush.bf16.msra.mxu3 %v1333_v6 }
  0x2b   :  { %1456 = vmatpush.bf16.msra.mxu1 %v1332_v7  ;;  %257 = vmatpush.bf16.msra.mxu0 %v1332_v7 }
  0x2c   :  { %1457 = vmatpush.bf16.msra.mxu2 %v1332_v7  ;;  %1458 = vmatpush.bf16.msra.mxu3 %v1332_v7 }
  0x2e   :  { %268 = vmatmul.bf16.vlgmr.msra.gmra.mxu1 %v1342_v8  ;;  %258 = vmatmul.bf16.vlgmr.msra.gmra.mxu0 %v1340_v9 }
  0x2f   :  { %412 = vmatpush.bf16.msrb.mxu1 %v1339_v0  ;;  %278 = vmatmul.bf16.vlgmr.msra.gmra.mxu2 %v1344_v14 }
  0x30   :  { %288 = vmatmul.bf16.vlgmr.msra.gmra.mxu3 %v1346_v18  ;;  %889 = vmatpush.bf16.msrb.mxu2 %v1371_v21 }
  0x31   :  { %938 = vmatpush.bf16.msrb.mxu3 %v1379_v23  ;;  %987 = vmatpush.bf16.msrb.mxu0 %v1387_v25 }
  0x33   :  { %413 = vmatpush.bf16.msrb.mxu1 %v1338_v1 }
  0x34   :  { %890 = vmatpush.bf16.msrb.mxu2 %v1370_v22 }
  0x35   :  { %939 = vmatpush.bf16.msrb.mxu3 %v1378_v28  ;;  %988 = vmatpush.bf16.msrb.mxu0 %v1386_v29  ;;  %v1361_v28 = vld [vmem:[#allocation3 + $0x28] sm:$0xff] }
  0x37   :  { %414 = vmatpush.bf16.msrb.mxu1 %v1337_v2 }
  0x38   :  { %891 = vmatpush.bf16.msrb.mxu2 %v1369_v24 }
  0x39   :  { %940 = vmatpush.bf16.msrb.mxu3 %v1377_v31  ;;  %989 = vmatpush.bf16.msrb.mxu0 %v1385_v32 }
  0x3b   :  { %415 = vmatpush.bf16.msrb.mxu1 %v1336_v3 }
  0x3c   :  { %892 = vmatpush.bf16.msrb.mxu2 %v1368_v27 }
  0x3d   :  { %941 = vmatpush.bf16.msrb.mxu3 %v1376_v34  ;;  %990 = vmatpush.bf16.msrb.mxu0 %v1384_v35 }
  0x3e   :  { %273 = vmatmul.bf16.gmra.mxu1 %v1343_v10  ;;  %263 = vmatmul.bf16.gmra.mxu0 %v1341_v11 }
  0x3f   :  { %416 = vmatpush.bf16.msrb.mxu1 %v1335_v4  ;;  %283 = vmatmul.bf16.gmra.mxu2 %v1345_v16 }
  0x40   :  { %293 = vmatmul.bf16.gmra.mxu3 %v1347_v20  ;;  %893 = vmatpush.bf16.msrb.mxu2 %v1367_v30 }
  0x41   :  { %942 = vmatpush.bf16.msrb.mxu3 %v1375_v37  ;;  %991 = vmatpush.bf16.msrb.mxu0 %v1383_v38 }
  0x43   :  { %417 = vmatpush.bf16.msrb.mxu1 %v1334_v5  ;;  %v1359_v5 = vld [vmem:[#allocation3 + $0x18] sm:$0xff] }
  0x44   :  { %894 = vmatpush.bf16.msrb.mxu2 %v1366_v33 }
  0x45   :  { %943 = vmatpush.bf16.msrb.mxu3 %v1374_v42  ;;  %992 = vmatpush.bf16.msrb.mxu0 %v1382_v43 }
  0x47   :  { %418 = vmatpush.bf16.msrb.mxu1 %v1333_v6 }
  0x48   :  { %895 = vmatpush.bf16.msrb.mxu2 %v1365_v36 }
  0x49   :  { %944 = vmatpush.bf16.msrb.mxu3 %v1373_v45  ;;  %993 = vmatpush.bf16.msrb.mxu0 %v1381_v46 }
  0x4b   :  { %419 = vmatpush.bf16.msrb.mxu1 %v1332_v7 }
  0x4c   :  { %896 = vmatpush.bf16.msrb.mxu2 %v1364_v41 }
  0x4d   :  { %945 = vmatpush.bf16.msrb.mxu3 %v1372_v48  ;;  %994 = vmatpush.bf16.msrb.mxu0 %v1380_v49 }
  0x4e   :  { %420 = vmatmul.bf16.vlgmr.msrb.gmra.mxu1 %v1348_v12 }
  0x4f   :  { %897 = vmatmul.bf16.vlgmr.msrb.gmra.mxu2 %v1356_v44 }
  0x5e   :  { %425 = vmatmul.bf16.gmra.mxu1 %v1349_v13 }
  0x5f   :  { %902 = vmatmul.bf16.gmra.mxu2 %v1357_v52 }
  0x6e   :  { %430 = vmatmul.bf16.gmra.mxu1 %v1350_v15 }
  0x6f   :  { %907 = vmatmul.bf16.gmra.mxu2 %v1358_v56 }
  0x7e   :  { %435 = vmatmul.bf16.gmra.mxu1 %v1351_v17  ;;  %v1360_v17 = vld [vmem:[#allocation3 + $0x20] sm:$0xff] }
  0x7f   :  { %912 = vmatmul.bf16.gmra.mxu2 %v1359_v5 }
  0x8e   :  { %440 = vmatmul.bf16.gmra.mxu1 %v1352_v19 }
  0x8f   :  { %917 = vmatmul.bf16.gmra.mxu2 %v1360_v17 }
  0x9e   :  { %445 = vmatmul.bf16.gmra.mxu1 %v1353_v26 }
  0x9f   :  { %922 = vmatmul.bf16.gmra.mxu2 %v1361_v28 }
  0xab   :  { %v269_v40 = vpop.f32.mrf.mxu1  ;;  %v259_v54 = vpop.f32.mrf.mxu0 }
  0xae   :  { %450 = vmatmul.bf16.gmra.mxu1 %v1354_v39 }
  0xb2   :  { %v279_v32 = vpop.f32.mrf.mxu2 }
  0xb3   :  { %v271_v47 = vpop.f32.mrf.mxu1  ;;  %v261_v57 = vpop.f32.mrf.mxu0 }
  0xba   :  { %v281_v41 = vpop.f32.mrf.mxu2 }
  0xbb   :  { %v274_v51 = vpop.f32.mrf.mxu1  ;;  %v264_v3 = vpop.f32.mrf.mxu0 }
  0xbe   :  { %455 = vmatmul.bf16.gmra.mxu1 %v1355_v50 }
  0xc3   :  { %v276_v53 = vpop.f32.mrf.mxu1  ;;  %v266_v7 = vpop.f32.mrf.mxu0 }
  0xcb   :  { %v421_v55 = vpop.f32.mrf.mxu1 }
  0xcc   :  { %v549_v58 = vpack.c.bf16 %v421_v55, %v259_v54 }
  0xce   :  { %v629_v61 = vunpack.c.l.b16 %v549_v58  ;;  %v630_v62 = vunpack.c.h.b16 %v549_v58  ;;  %v289_v58 = vpop.f32.mrf.mxu3 }
  0xd3   :  { %v423_v59 = vpop.f32.mrf.mxu1 }
  0xd4   :  { %v550_v60 = vpack.c.bf16 %v423_v59, %v261_v57 }
  0xd6   :  { %v631_v63 = vunpack.c.l.b16 %v550_v60  ;;  %v632_v0 = vunpack.c.h.b16 %v550_v60 }
  0xd8   :  { %v661_v1 = vpack.c.b16 %v631_v63, %v629_v61  ;;  %v662_v2 = vpack.c.b16 %v632_v0, %v630_v62 }
  0xda   :  { %946 = vmatmul.bf16.vlgmr.msrb.gmra.mxu3 %v661_v1  ;;  %995 = vmatmul.bf16.vlgmr.msrb.gmra.mxu0 %v662_v2  ;;  %v291_v2 = vpop.f32.mrf.mxu3 }
  0xdb   :  { %v426_v4 = vpop.f32.mrf.mxu1 }
  0xdc   :  { %v551_v6 = vpack.c.bf16 %v426_v4, %v264_v3 }
  0xde   :  { %v633_v10 = vunpack.c.l.b16 %v551_v6  ;;  %v634_v11 = vunpack.c.h.b16 %v551_v6 }
  0xe3   :  { %v428_v8 = vpop.f32.mrf.mxu1 }
  0xe4   :  { %v552_v9 = vpack.c.bf16 %v428_v8, %v266_v7 }
  0xe6   :  { %v635_v12 = vunpack.c.l.b16 %v552_v9  ;;  %v636_v13 = vunpack.c.h.b16 %v552_v9 }
  0xe8   :  { %v663_v14 = vpack.c.b16 %v635_v12, %v633_v10  ;;  %v664_v15 = vpack.c.b16 %v636_v13, %v634_v11  ;;  %v294_v12 = vpop.f32.mrf.mxu3 }
  0xea   :  { %951 = vmatmul.bf16.gmra.mxu3 %v663_v14  ;;  %1000 = vmatmul.bf16.gmra.mxu0 %v664_v15 }
  0xeb   :  { %v431_v16 = vpop.f32.mrf.mxu1 }
  0xec   :  { %v553_v18 = vpack.c.bf16 %v431_v16, %v269_v40  ;;  %v1362_v40 = vld [vmem:[#allocation3 + $0x30] sm:$0xff] }
  0xed   :  { %927 = vmatmul.bf16.gmra.mxu2 %v1362_v40 }
  0xee   :  { %v637_v21 = vunpack.c.l.b16 %v553_v18  ;;  %v638_v22 = vunpack.c.h.b16 %v553_v18 }
  0xf0   :  { %v296_v16 = vpop.f32.mrf.mxu3 }
  0xf3   :  { %v433_v19 = vpop.f32.mrf.mxu1 }
  0xf4   :  { %v554_v20 = vpack.c.bf16 %v433_v19, %v271_v47 }
  0xf6   :  { %v639_v23 = vunpack.c.l.b16 %v554_v20  ;;  %v640_v24 = vunpack.c.h.b16 %v554_v20 }
  0xf8   :  { %v665_v25 = vpack.c.b16 %v639_v23, %v637_v21  ;;  %v666_v26 = vpack.c.b16 %v640_v24, %v638_v22 }
  0xfa   :  { %956 = vmatmul.bf16.gmra.mxu3 %v665_v25  ;;  %1005 = vmatmul.bf16.gmra.mxu0 %v666_v26 }
  0xfb   :  { %v436_v27 = vpop.f32.mrf.mxu1 }
  0xfc   :  { %v555_v29 = vpack.c.bf16 %v436_v27, %v274_v51  ;;  %v284_v51 = vpop.f32.mrf.mxu2 }
  0xfe   :  { %v641_v33 = vunpack.c.l.b16 %v555_v29  ;;  %v642_v34 = vunpack.c.h.b16 %v555_v29  ;;  %v1620_v29 = vld [vmem:[%s1647_s3] ss:$0 sm:$0xff]  ;;  %s1573_s3 = smov [#allocation9]  }
  0xff   :  { %s1088_s5 = sshll.u32 %s1573_s3, 4  ;;  %s1089_s5 = int_to_ptr.vmem [resolvable:$true] %s1088_s5 }
 0x103   :  { %v438_v30 = vpop.f32.mrf.mxu1 }
 0x104   :  { %v556_v31 = vpack.c.bf16 %v438_v30, %v276_v53  ;;  %v1363_v53 = vld [vmem:[#allocation3 + $0x38] sm:$0xff]  ;;  %v286_v55 = vpop.f32.mrf.mxu2 }
 0x105   :  { %932 = vmatmul.bf16.gmra.mxu2 %v1363_v53 }
 0x106   :  { %v643_v35 = vunpack.c.l.b16 %v556_v31  ;;  %v644_v36 = vunpack.c.h.b16 %v556_v31 }
 0x108   :  { %v667_v37 = vpack.c.b16 %v643_v35, %v641_v33  ;;  %v668_v38 = vpack.c.b16 %v644_v36, %v642_v34 }
 0x10a   :  { %961 = vmatmul.bf16.gmra.mxu3 %v667_v37  ;;  %1010 = vmatmul.bf16.gmra.mxu0 %v668_v38 }
 0x10b   :  { %v441_v39 = vpop.f32.mrf.mxu1 }
 0x10c   :  { %v557_v42 = vpack.c.bf16 %v441_v39, %v279_v32  ;;  %v898_v14 = vpop.f32.mrf.mxu2 }
 0x10d   :  { %v899_v31 = vadd.f32 %v1620_v29, %v898_v14 }
 0x10e   :  { %v645_v45 = vunpack.c.l.b16 %v557_v42  ;;  %v646_v46 = vunpack.c.h.b16 %v557_v42 }
 0x113   :  { %v443_v43 = vpop.f32.mrf.mxu1 }
 0x114   :  { %v558_v44 = vpack.c.bf16 %v443_v43, %v281_v41  ;;  %v900_v19 = vpop.f32.mrf.mxu2 }
 0x115   :  { %v901_v35 = vadd.f32 %v1620_v29, %v900_v19 }
 0x116   :  { %v647_v47 = vunpack.c.l.b16 %v558_v44  ;;  %v648_v48 = vunpack.c.h.b16 %v558_v44 }
 0x118   :  { %v669_v49 = vpack.c.b16 %v647_v47, %v645_v45  ;;  %v670_v50 = vpack.c.b16 %v648_v48, %v646_v46 }
 0x11a   :  { %966 = vmatmul.bf16.gmra.mxu3 %v669_v49  ;;  %1015 = vmatmul.bf16.gmra.mxu0 %v670_v50 }
 0x11b   :  { %v446_v52 = vpop.f32.mrf.mxu1 }
 0x11c   :  { %v559_v54 = vpack.c.bf16 %v446_v52, %v284_v51  ;;  %v903_v26 = vpop.f32.mrf.mxu2 }
 0x11d   :  { %v904_v46 = vadd.f32 %v1620_v29, %v903_v26 }
 0x11e   :  { %v649_v59 = vunpack.c.l.b16 %v559_v54  ;;  %v650_v60 = vunpack.c.h.b16 %v559_v54 }
 0x123   :  { %v448_v56 = vpop.f32.mrf.mxu1 }
 0x124   :  { %v560_v57 = vpack.c.bf16 %v448_v56, %v286_v55  ;;  %v905_v28 = vpop.f32.mrf.mxu2 }
 0x125   :  { %v906_v49 = vadd.f32 %v1620_v29, %v905_v28 }
 0x126   :  { %v651_v61 = vunpack.c.l.b16 %v560_v57  ;;  %v652_v62 = vunpack.c.h.b16 %v560_v57 }
 0x128   :  { %v671_v63 = vpack.c.b16 %v651_v61, %v649_v59  ;;  %v672_v0 = vpack.c.b16 %v652_v62, %v650_v60 }
 0x12a   :  { %971 = vmatmul.bf16.gmra.mxu3 %v671_v63  ;;  %1020 = vmatmul.bf16.gmra.mxu0 %v672_v0 }
 0x12b   :  { %v451_v1 = vpop.f32.mrf.mxu1 }
 0x12c   :  { %v561_v3 = vpack.c.bf16 %v451_v1, %v289_v58  ;;  %v908_v34 = vpop.f32.mrf.mxu2 }
 0x12d   :  { %v909_v60 = vadd.f32 %v1620_v29, %v908_v34 }
 0x12e   :  { %v653_v6 = vunpack.c.l.b16 %v561_v3  ;;  %v654_v7 = vunpack.c.h.b16 %v561_v3 }
 0x133   :  { %v453_v4 = vpop.f32.mrf.mxu1 }
 0x134   :  { %v562_v5 = vpack.c.bf16 %v453_v4, %v291_v2  ;;  %v910_v45 = vpop.f32.mrf.mxu2 }
 0x135   :  { %v911_v0 = vadd.f32 %v1620_v29, %v910_v45 }
 0x136   :  { %v655_v8 = vunpack.c.l.b16 %v562_v5  ;;  %v656_v9 = vunpack.c.h.b16 %v562_v5 }
 0x138   :  { %v673_v10 = vpack.c.b16 %v655_v8, %v653_v6  ;;  %v674_v11 = vpack.c.b16 %v656_v9, %v654_v7 }
 0x13a   :  { %976 = vmatmul.bf16.gmra.mxu3 %v673_v10  ;;  %1025 = vmatmul.bf16.gmra.mxu0 %v674_v11 }
 0x13b   :  { %v456_v13 = vpop.f32.mrf.mxu1 }
 0x13c   :  { %v563_v15 = vpack.c.bf16 %v456_v13, %v294_v12  ;;  %v913_v54 = vpop.f32.mrf.mxu2 }
 0x13d   :  { %v914_v11 = vadd.f32 %v1620_v29, %v913_v54 }
 0x13e   :  { %v657_v20 = vunpack.c.l.b16 %v563_v15  ;;  %v658_v21 = vunpack.c.h.b16 %v563_v15 }
 0x143   :  { %v458_v17 = vpop.f32.mrf.mxu1 }
 0x144   :  { %v564_v18 = vpack.c.bf16 %v458_v17, %v296_v16  ;;  %v915_v62 = vpop.f32.mrf.mxu2 }
 0x145   :  { %v916_v14 = vadd.f32 %v1620_v29, %v915_v62 }
 0x146   :  { %v659_v22 = vunpack.c.l.b16 %v564_v18  ;;  %v660_v23 = vunpack.c.h.b16 %v564_v18 }
 0x148   :  { %v675_v24 = vpack.c.b16 %v659_v22, %v657_v20  ;;  %v676_v25 = vpack.c.b16 %v660_v23, %v658_v21 }
 0x14a   :  { %981 = vmatmul.bf16.gmra.mxu3 %v675_v24  ;;  %1030 = vmatmul.bf16.gmra.mxu0 %v676_v25 }
 0x14c   :  { %v918_v8 = vpop.f32.mrf.mxu2 }
 0x14d   :  { %v919_v25 = vadd.f32 %v1620_v29, %v918_v8 }
 0x154   :  { %v920_v16 = vpop.f32.mrf.mxu2 }
 0x157   :  { %v996_v27 = vpop.f32.mrf.mxu0 }
 0x15d   :  { %v947_v30 = vpop.f32.mrf.mxu3 }
 0x15e   :  { %v948_v33 = vadd.f32 %v947_v30, %v899_v31  ;;  %v921_v30 = vadd.f32 %v1620_v29, %v920_v16 }
 0x15f   :  { %v998_v32 = vpop.f32.mrf.mxu0 }
 0x160   :  { %v997_v37 = vadd.f32 %v996_v27, %v948_v33  ;;  %v923_v27 = vpop.f32.mrf.mxu2 }
 0x162   :  { %v1036_v41 = vmax.f32 %v997_v37, 0.0 }
 0x165   :  { %v949_v36 = vpop.f32.mrf.mxu3 }
 0x166   :  { %v950_v38 = vadd.f32 %v949_v36, %v901_v35 }
 0x167   :  { %v1001_v39 = vpop.f32.mrf.mxu0 }
 0x168   :  { %v999_v40 = vadd.f32 %v998_v32, %v950_v38  ;;  %v925_v36 = vpop.f32.mrf.mxu2 }
 0x169   :  { %v926_v45 = vadd.f32 %v1620_v29, %v925_v36 }
 0x16a   :  { %v1037_v42 = vmax.f32 %v999_v40, 0.0 }
 0x16c   :  { %v1391_v43 = vpack.c.bf16 %v1037_v42, %v1036_v41  ;;  %v924_v41 = vadd.f32 %v1620_v29, %v923_v27 }
 0x16d   :  { %v952_v44 = vpop.f32.mrf.mxu3 }
 0x16e   :  { %1392 = vst [vmem:[#allocation9] sm:$0xff] %v1391_v43   ;;  %v953_v48 = vadd.f32 %v952_v44, %v904_v46 }
 0x16f   :  { %v1003_v47 = vpop.f32.mrf.mxu0 }
 0x170   :  { %v1002_v51 = vadd.f32 %v1001_v39, %v953_v48  ;;  %v928_v44 = vpop.f32.mrf.mxu2 }
 0x172   :  { %v1038_v56 = vmax.f32 %v1002_v51, 0.0 }
 0x175   :  { %v954_v50 = vpop.f32.mrf.mxu3 }
 0x176   :  { %v955_v52 = vadd.f32 %v954_v50, %v906_v49 }
 0x177   :  { %v1006_v53 = vpop.f32.mrf.mxu0 }
 0x178   :  { %v1004_v55 = vadd.f32 %v1003_v47, %v955_v52  ;;  %v930_v54 = vpop.f32.mrf.mxu2 }
 0x17a   :  { %v1039_v57 = vmax.f32 %v1004_v55, 0.0 }
 0x17c   :  { %v1396_v58 = vpack.c.bf16 %v1039_v57, %v1038_v56  ;;  %v929_v56 = vadd.f32 %v1620_v29, %v928_v44 }
 0x17d   :  { %v957_v59 = vpop.f32.mrf.mxu3 }
 0x17e   :  { %1428 = vst [vmem:[#allocation9 + $0x8] sm:$0xff] %v1396_v58   ;;  %v958_v63 = vadd.f32 %v957_v59, %v909_v60  ;;  %v931_v59 = vadd.f32 %v1620_v29, %v930_v54 }
 0x17f   :  { %v1008_v61 = vpop.f32.mrf.mxu0 }
 0x180   :  { %v1007_v2 = vadd.f32 %v1006_v53, %v958_v63 }
 0x182   :  { %v1040_v6 = vmax.f32 %v1007_v2, 0.0 }
 0x185   :  { %v959_v1 = vpop.f32.mrf.mxu3 }
 0x186   :  { %v960_v3 = vadd.f32 %v959_v1, %v911_v0 }
 0x187   :  { %v1011_v4 = vpop.f32.mrf.mxu0 }
 0x188   :  { %v1009_v5 = vadd.f32 %v1008_v61, %v960_v3  ;;  %v933_v63 = vpop.f32.mrf.mxu2 }
 0x18a   :  { %v1041_v7 = vmax.f32 %v1009_v5, 0.0 }
 0x18c   :  { %v1401_v9 = vpack.c.bf16 %v1041_v7, %v1040_v6  ;;  %v934_v6 = vadd.f32 %v1620_v29, %v933_v63 }
 0x18d   :  { %v962_v10 = vpop.f32.mrf.mxu3 }
 0x18e   :  { %1429 = vst [vmem:[#allocation9 + $0x10] sm:$0xff] %v1401_v9   ;;  %v963_v13 = vadd.f32 %v962_v10, %v914_v11 }
 0x18f   :  { %v1013_v12 = vpop.f32.mrf.mxu0 }
 0x190   :  { %v1012_v17 = vadd.f32 %v1011_v4, %v963_v13  ;;  %v935_v7 = vpop.f32.mrf.mxu2 }
 0x191   :  { %v936_v9 = vadd.f32 %v1620_v29, %v935_v7 }
 0x192   :  { %v1042_v21 = vmax.f32 %v1012_v17, 0.0 }
 0x195   :  { %v964_v15 = vpop.f32.mrf.mxu3 }
 0x196   :  { %v965_v18 = vadd.f32 %v964_v15, %v916_v14 }
 0x197   :  { %v1016_v19 = vpop.f32.mrf.mxu0 }
 0x198   :  { %v1014_v20 = vadd.f32 %v1013_v12, %v965_v18 }
 0x19a   :  { %v1043_v22 = vmax.f32 %v1014_v20, 0.0 }
 0x19c   :  { %v1406_v23 = vpack.c.bf16 %v1043_v22, %v1042_v21 }
 0x19d   :  { %v967_v24 = vpop.f32.mrf.mxu3 }
 0x19e   :  { %1430 = vst [vmem:[#allocation9 + $0x18] sm:$0xff] %v1406_v23   ;;  %v968_v28 = vadd.f32 %v967_v24, %v919_v25 }
 0x19f   :  { %v1018_v26 = vpop.f32.mrf.mxu0 }
 0x1a0   :  { %v1017_v32 = vadd.f32 %v1016_v19, %v968_v28 }
 0x1a2   :  { %v1044_v37 = vmax.f32 %v1017_v32, 0.0 }
 0x1a5   :  { %v969_v31 = vpop.f32.mrf.mxu3 }
 0x1a6   :  { %v970_v33 = vadd.f32 %v969_v31, %v921_v30 }
 0x1a7   :  { %v1021_v34 = vpop.f32.mrf.mxu0 }
 0x1a8   :  { %v1019_v35 = vadd.f32 %v1018_v26, %v970_v33 }
 0x1aa   :  { %v1045_v38 = vmax.f32 %v1019_v35, 0.0 }
 0x1ac   :  { %v1411_v39 = vpack.c.bf16 %v1045_v38, %v1044_v37 }
 0x1ad   :  { %v972_v40 = vpop.f32.mrf.mxu3 }
 0x1ae   :  { %1431 = vst [vmem:[#allocation9 + $0x20] sm:$0xff] %v1411_v39   ;;  %v973_v43 = vadd.f32 %v972_v40, %v924_v41 }
 0x1af   :  { %v1023_v42 = vpop.f32.mrf.mxu0 }
 0x1b0   :  { %v1022_v47 = vadd.f32 %v1021_v34, %v973_v43 }
 0x1b2   :  { %v1046_v51 = vmax.f32 %v1022_v47, 0.0 }
 0x1b5   :  { %v974_v46 = vpop.f32.mrf.mxu3 }
 0x1b6   :  { %v975_v48 = vadd.f32 %v974_v46, %v926_v45 }
 0x1b7   :  { %v1026_v50 = vpop.f32.mrf.mxu0 }
 0x1b8   :  { %v1024_v49 = vadd.f32 %v1023_v42, %v975_v48 }
 0x1ba   :  { %v1047_v52 = vmax.f32 %v1024_v49, 0.0 }
 0x1bc   :  { %v1416_v53 = vpack.c.bf16 %v1047_v52, %v1046_v51 }
 0x1bd   :  { %v977_v55 = vpop.f32.mrf.mxu3 }
 0x1be   :  { %1432 = vst [vmem:[#allocation9 + $0x28] sm:$0xff] %v1416_v53   ;;  %v978_v57 = vadd.f32 %v977_v55, %v929_v56 }
 0x1bf   :  { %v1028_v58 = vpop.f32.mrf.mxu0 }
 0x1c0   :  { %v1027_v61 = vadd.f32 %v1026_v50, %v978_v57 }
 0x1c2   :  { %v1048_v1 = vmax.f32 %v1027_v61, 0.0 }
 0x1c5   :  { %v979_v60 = vpop.f32.mrf.mxu3 }
 0x1c6   :  { %v980_v62 = vadd.f32 %v979_v60, %v931_v59 }
 0x1c7   :  { %v1031_v4 = vpop.f32.mrf.mxu0 }
 0x1c8   :  { %v1029_v0 = vadd.f32 %v1028_v58, %v980_v62 }
 0x1ca   :  { %v1049_v2 = vmax.f32 %v1029_v0, 0.0 }
 0x1cc   :  { %v1421_v3 = vpack.c.bf16 %v1049_v2, %v1048_v1 }
 0x1cd   :  { %v982_v5 = vpop.f32.mrf.mxu3 }
 0x1ce   :  { %1433 = vst [vmem:[#allocation9 + $0x30] sm:$0xff] %v1421_v3   ;;  %v983_v8 = vadd.f32 %v982_v5, %v934_v6 }
 0x1cf   :  { %v1033_v13 = vpop.f32.mrf.mxu0 }
 0x1d0   :  { %v1032_v11 = vadd.f32 %v1031_v4, %v983_v8 }
 0x1d2   :  { %v1050_v15 = vmax.f32 %v1032_v11, 0.0 }
 0x1d5   :  { %v984_v10 = vpop.f32.mrf.mxu3 }
 0x1d6   :  { %v985_v12 = vadd.f32 %v984_v10, %v936_v9 }
 0x1d8   :  { %v1034_v14 = vadd.f32 %v1033_v13, %v985_v12 }
 0x1da   :  { %v1051_v16 = vmax.f32 %v1034_v14, 0.0 }
 0x1dc   :  { %v1426_v17 = vpack.c.bf16 %v1051_v16, %v1050_v15 }
 0x1de   :  { %1434 = vst [vmem:[#allocation9 + $0x38] sm:$0xff] %v1426_v17  }
 0x1df   :  { %1096 = dma.vmem_to_hbm [thread:$0]  %s1089_s5, 1024, %s1091_s8, [#allocation5], %s1569_s23, %s1569_s23, %s1570_s24  }
 0x1e0   :  { %1566 = dma.done.wait [#allocation5], 1024  }
 0x1e1   :  { %1567 = vsyncadd [#allocation5], 4294966272 }
 0x1e2   :  { %1101 = vsyncpa [#allocation4], 1 }
 0x1e3   :  { %1102 = vsyncpa [#allocation7], 1 }
 0x1e4   :  { %1103 = vsyncpa [#allocation5], 1 }

</bundles_post_ra>
